<compile_context>
chip_gen: v5e
topology: v5e:2x2
jax: 0.10.0
libtpu: 0.0.40
codegen_flags: <defaults>
</compile_context>

<pallas_src>
import functools

import jax
import jax.numpy as jnp
from jax.experimental import pallas as pl
from jax.experimental.pallas import tpu as pltpu


def _round_up(x, m):
    return ((x + m - 1) // m) * m


def _choose_batch_tile(B, max_tile=4096):
    """Lane-dense batch tile (multiple of 128).

    Big enough to amortize the ~0.35us per-grid-step pipeline overhead, small enough
    that padding waste stays bounded; prefers >=2 tiles (v7x megacore split) when that
    does not inflate padding beyond ~12.5% of the real batch.
    """
    B128 = _round_up(B, 128)
    cols = B128 // 128
    max_cols = max_tile // 128
    n = -(-cols // max_cols)                      # tiles needed to keep each <= max_tile
    if n < 2 and cols >= 2:
        tb2 = -(-cols // 2) * 128                 # try 2 tiles for the 2 v7x TensorCores
        if _round_up(B, tb2) <= max(B128, int(B * 1.125)):
            return tb2
    return -(-cols // n) * 128


def deepfm_kernel(xT_ref, w_ref, b1_ref, w2_ref, b2_ref, o_ref, *, hidden_dim):
    """One batch tile (TB lane-dense columns).

    xT_ref : (D_pad, TB) bf16 | w_ref: (H_aug, D_pad) bf16 | b1_ref/w2_ref: (H, 1) f32
    b2_ref : (1, 1) f32       | o_ref: (1, TB) f32 (lane-dense)
    """
    H = hidden_dim
    xT = xT_ref[...]                                                   # (D_pad, TB) bf16
    # fc1 + FM sum in a single MXU call (f32 accumulate): rows [0:H] are W1^T,
    # row H is all-ones so hh[H, :] == sum_d x[d, :].
    hh = jnp.dot(w_ref[...], xT, preferred_element_type=jnp.float32)   # (H_aug, TB) f32
    fm = hh[H:H + 1, :]                                                # (1, TB)
    h = jnp.maximum(hh[0:H, :] + b1_ref[...], 0.0)                     # (H, TB), bias bcast lanes
    # fc2: VPU multiply + sublane reduce instead of a skinny (H, 1) matmul.
    deep = jnp.sum(h * w2_ref[...], axis=0, keepdims=True)             # (1, TB)
    z = fm + deep + b2_ref[...]
    # Exact sigmoid: only one (1, TB) row, so the exact divide costs ~nothing.
    o_ref[...] = 10.0 / (1.0 + jnp.exp(-z))


def deepfm_forward(user, item, feature, params, *, batch_tile=None):
    """Embedding gathers in JAX; FM + MLP + sigmoid fused in one Pallas kernel."""
    # --- embedding gathers (JAX glue), cast to bf16 before assembling x^T so the
    #     pre-kernel concat/transpose/pad fusion moves half the HBM bytes ---
    parts = [params["user_emb"][user], params["item_emb"][item]]
    parts += [tbl[feature[:, i]] for i, tbl in enumerate(params["feature_embs"])]
    parts = [p.astype(jnp.bfloat16) for p in parts]
    # TODO(synk): fuse the gathers into the kernel (PrefetchScalarGridSpec + per-row DMA)
    # and/or keep x in natural (B, D) layout with an in-kernel transpose, to remove the
    # x^T HBM round trip entirely.
    xT = jnp.concatenate([p.T for p in parts], axis=0)                 # (D, B) bf16

    D, B = xT.shape
    H = params["W1"].shape[1]

    TB = batch_tile if batch_tile is not None else _choose_batch_tile(B)
    B_pad = _round_up(B, TB)
    D_pad = _round_up(D, 16)          # bf16 sublane packing
    H_aug = _round_up(H + 1, 8)       # fc1 rows + 1 ones row (FM), sublane aligned

    xT_p = jnp.pad(xT, ((0, D_pad - D), (0, B_pad - B)))               # (D_pad, B_pad) bf16

    # Augmented fc1 weight: rows [0:H] = W1^T, row H = ones (FM sum), rest zero padding.
    W_aug = jnp.zeros((H_aug, D_pad), jnp.float32)
    W_aug = W_aug.at[:H, :D].set(params["W1"].T)
    W_aug = W_aug.at[H, :D].set(1.0)
    W_aug = W_aug.astype(jnp.bfloat16)

    b1 = params["b1"].reshape(H, 1).astype(jnp.float32)
    w2 = params["W2"].reshape(H, 1).astype(jnp.float32)
    b2 = params["b2"].reshape(1, 1).astype(jnp.float32)

    grid = (B_pad // TB,)

    # VMEM budget: double-buffered bf16 x tile + block-invariant weights + lane-padded
    # bias/weight vectors + output row + in-kernel f32 temporaries (hh / relu / mul).
    vmem_need = (
        2 * D_pad * TB * 2                # x^T tile, bf16, double buffered
        + 2 * H_aug * D_pad * 2           # W_aug bf16 (block-invariant, 2 bufs)
        + 2 * (2 * H + 8) * 128 * 4       # b1 / w2 / b2 padded to 128 lanes
        + 2 * 8 * TB * 4                  # (1, TB) f32 output row, sublane padded
        + 3 * H_aug * TB * 4              # hh + relu + w2-mul f32 temporaries
        + 4 * 8 * TB * 4                  # (1, TB) f32 row temporaries (fm/deep/z/exp)
    )
    vmem_limit = int(min(max(2 * vmem_need, 4 << 20), 32 << 20))       # need + headroom

    cost = pl.CostEstimate(
        flops=2 * B_pad * D_pad * H_aug + B_pad * (3 * H + 8),
        transcendentals=B_pad,
        bytes_accessed=2 * D_pad * B_pad + 2 * H_aug * D_pad + 4 * (2 * H + 1) + 4 * B_pad,
    )

    out_row = pl.pallas_call(
        functools.partial(deepfm_kernel, hidden_dim=H),
        out_shape=jax.ShapeDtypeStruct((1, B_pad), jnp.float32),
        grid=grid,
        in_specs=[
            pl.BlockSpec((D_pad, TB), lambda i: (0, i)),     # x^T tiled over batch (pipelined)
            pl.BlockSpec((H_aug, D_pad), lambda i: (0, 0)),  # weights block-invariant (resident)
            pl.BlockSpec((H, 1), lambda i: (0, 0)),
            pl.BlockSpec((H, 1), lambda i: (0, 0)),
            pl.BlockSpec((1, 1), lambda i: (0, 0)),
        ],
        out_specs=pl.BlockSpec((1, TB), lambda i: (0, i)),   # lane-dense output row
        compiler_params=pltpu.CompilerParams(
            dimension_semantics=("parallel",),               # v7x: batch tiles across 2 TCs
            vmem_limit_bytes=vmem_limit,
        ),
        cost_estimate=cost,
    )(xT_p, W_aug, b1, w2, b2)

    return out_row[0, :B].reshape(B, 1)


def init_params(key, num_users, num_items, feature_sizes, embedding_dim, hidden_dim):
    field_size = len(feature_sizes)
    D = embedding_dim * (2 + field_size)
    keys = jax.random.split(key, 6 + field_size)
    return {
        "user_emb": jax.random.normal(keys[0], (num_users, embedding_dim), jnp.float32) * 0.1,
        "item_emb": jax.random.normal(keys[1], (num_items, embedding_dim), jnp.float32) * 0.1,
        "feature_embs": [
            jax.random.normal(keys[2 + i], (fs, embedding_dim), jnp.float32) * 0.1
            for i, fs in enumerate(feature_sizes)
        ],
        "W1": jax.random.normal(keys[2 + field_size], (D, hidden_dim), jnp.float32) * 0.1,
        "b1": jax.random.normal(keys[3 + field_size], (hidden_dim,), jnp.float32) * 0.1,
        "W2": jax.random.normal(keys[4 + field_size], (hidden_dim, 1), jnp.float32) * 0.1,
        "b2": jax.random.normal(keys[5 + field_size], (1,), jnp.float32) * 0.1,
    }


def reference_forward(user, item, feature, params):
    """Pure-JAX f32 reference mirroring the PyTorch forward exactly."""
    user_emb = params["user_emb"][user]
    item_emb = params["item_emb"][item]
    feat_embs = [tbl[feature[:, i]] for i, tbl in enumerate(params["feature_embs"])]
    fm_terms = jnp.concatenate([user_emb, item_emb, *feat_embs], axis=1)
    fm_interactions = jnp.sum(fm_terms, axis=1, keepdims=True)
    deep = jnp.maximum(fm_terms @ params["W1"] + params["b1"], 0.0)
    deep = deep @ params["W2"] + params["b2"]
    return jax.nn.sigmoid(fm_interactions + deep) * 10.0


if __name__ == "__main__":
    # Small deterministic config
    num_users, num_items = 16, 16
    feature_sizes = [5, 7, 9]          # field_size = 3
    embedding_dim, hidden_dim = 8, 32  # D = 8 * 5 = 40
    B = 8

    key = jax.random.PRNGKey(0)
    pkey, dkey = jax.random.split(key)
    params = init_params(pkey, num_users, num_items, feature_sizes, embedding_dim, hidden_dim)

    k_u, k_i, k_f = jax.random.split(dkey, 3)
    user = jax.random.randint(k_u, (B,), 0, num_users)
    item = jax.random.randint(k_i, (B,), 0, num_items)
    feature = jnp.stack(
        [jax.random.randint(jax.random.fold_in(k_f, i), (B,), 0, fs)
         for i, fs in enumerate(feature_sizes)],
        axis=1,
    )  # (B, field_size)

    out = deepfm_forward(user, item, feature, params)
    out = jax.block_until_ready(out)

    ref = reference_forward(user, item, feature, params)
    assert out.shape == (B, 1), out.shape
    # bf16 matmul inputs (x and W1) vs f32 reference -> relaxed tolerance.
    assert jnp.allclose(out, ref, atol=3e-2, rtol=0.0), (out, ref, jnp.max(jnp.abs(out - ref)))

    print("KERNEL_OK")
</pallas_src>

<mosaic_0001>
module attributes {stable_mosaic.version = 11 : i64} {
  func.func @deepfm_kernel(%arg0: i32, %arg1: memref<48x128xbf16, #tpu.memory_space<vmem>>, %arg2: memref<40x48xbf16, #tpu.memory_space<vmem>>, %arg3: memref<32x1xf32, #tpu.memory_space<vmem>>, %arg4: memref<32x1xf32, #tpu.memory_space<vmem>>, %arg5: memref<1x1xf32, #tpu.memory_space<vmem>>, %arg6: memref<1x128xf32, #tpu.memory_space<vmem>>) attributes {dimension_semantics = [#tpu.dimension_semantics<parallel>], iteration_bounds = array<i64: 1>, scalar_prefetch = 0 : i64, scratch_operands = 0 : i64, tpu.core_type = #tpu.core_type<tc>, window_params = [{transform_indices = @transform_0, window_bounds = array<i64: 48, 128>}, {pipeline_mode = #tpu.pipeline_mode<synchronous>, transform_indices = @transform_1, window_bounds = array<i64: 40, 48>}, {pipeline_mode = #tpu.pipeline_mode<synchronous>, transform_indices = @transform_2, window_bounds = array<i64: 32, 1>}, {pipeline_mode = #tpu.pipeline_mode<synchronous>, transform_indices = @transform_3, window_bounds = array<i64: 32, 1>}, {pipeline_mode = #tpu.pipeline_mode<synchronous>, transform_indices = @transform_4, window_bounds = array<i64: 1, 1>}, {transform_indices = @transform_5, window_bounds = array<i64: 1, 128>}]} {
    %c0 = arith.constant 0 : index
    %c0_0 = arith.constant 0 : index
    %0 = vector.load %arg1[%c0, %c0_0] : memref<48x128xbf16, #tpu.memory_space<vmem>>, vector<48x128xbf16>
    %c0_1 = arith.constant 0 : index
    %c0_2 = arith.constant 0 : index
    %1 = vector.load %arg2[%c0_1, %c0_2] : memref<40x48xbf16, #tpu.memory_space<vmem>>, vector<40x48xbf16>
    %cst = arith.constant dense<0.000000e+00> : vector<40x128xf32>
    %2 = tpu.matmul %1, %0, %cst {dimension_numbers = #tpu.dot_dimension_numbers<[1], [0], [0], [1], [0, 0, 1, 1], [], []>} : vector<40x48xbf16>, vector<48x128xbf16>, vector<40x128xf32> -> vector<40x128xf32>
    %3 = vector.extract_strided_slice %2 {offsets = [32, 0], sizes = [1, 128], strides = [1, 1]} : vector<40x128xf32> to vector<1x128xf32>
    %4 = vector.extract_strided_slice %2 {offsets = [0, 0], sizes = [32, 128], strides = [1, 1]} : vector<40x128xf32> to vector<32x128xf32>
    %c0_3 = arith.constant 0 : index
    %c0_4 = arith.constant 0 : index
    %5 = vector.load %arg3[%c0_3, %c0_4] : memref<32x1xf32, #tpu.memory_space<vmem>>, vector<32x1xf32>
    %6 = vector.broadcast %5 : vector<32x1xf32> to vector<32x128xf32>
    %7 = arith.addf %4, %6 : vector<32x128xf32>
    %cst_5 = arith.constant 0.000000e+00 : f32
    %8 = vector.broadcast %cst_5 : f32 to vector<32x128xf32>
    %9 = arith.maximumf %7, %8 : vector<32x128xf32>
    %c0_6 = arith.constant 0 : index
    %c0_7 = arith.constant 0 : index
    %10 = vector.load %arg4[%c0_6, %c0_7] : memref<32x1xf32, #tpu.memory_space<vmem>>, vector<32x1xf32>
    %11 = vector.broadcast %10 : vector<32x1xf32> to vector<32x128xf32>
    %12 = arith.mulf %9, %11 : vector<32x128xf32>
    %cst_8 = arith.constant dense<0.000000e+00> : vector<128xf32>
    %13 = vector.multi_reduction <add>, %12, %cst_8 [0] : vector<32x128xf32> to vector<128xf32>
    %14 = vector.shape_cast %13 : vector<128xf32> to vector<1x128xf32>
    %15 = arith.addf %3, %14 : vector<1x128xf32>
    %c0_9 = arith.constant 0 : index
    %c0_10 = arith.constant 0 : index
    %16 = vector.load %arg5[%c0_9, %c0_10] : memref<1x1xf32, #tpu.memory_space<vmem>>, vector<1x1xf32>
    %17 = vector.broadcast %16 : vector<1x1xf32> to vector<1x128xf32>
    %18 = arith.addf %15, %17 : vector<1x128xf32>
    %cst_11 = arith.constant 0.000000e+00 : f32
    %19 = vector.broadcast %cst_11 : f32 to vector<1x128xf32>
    %20 = arith.subf %19, %18 : vector<1x128xf32>
    %21 = math.exp %20 : vector<1x128xf32>
    %cst_12 = arith.constant 1.000000e+00 : f32
    %22 = vector.broadcast %cst_12 : f32 to vector<1x128xf32>
    %23 = arith.addf %22, %21 : vector<1x128xf32>
    %cst_13 = arith.constant 1.000000e+01 : f32
    %24 = vector.broadcast %cst_13 : f32 to vector<1x128xf32>
    %25 = arith.divf %24, %23 : vector<1x128xf32>
    %c0_14 = arith.constant 0 : index
    %c0_15 = arith.constant 0 : index
    %26 = vector.load %arg6[%c0_14, %c0_15] : memref<1x128xf32, #tpu.memory_space<vmem>>, vector<1x128xf32>
    tpu.vector_store %arg6[%c0_14, %c0_15], %25 {strides = array<i32>} : memref<1x128xf32, #tpu.memory_space<vmem>>, vector<1x128xf32>,
    return
  }
  func.func @transform_0(%arg0: i32) -> (i32, i32) {
    %c0_i32 = arith.constant 0 : i32
    %c0_i32_0 = arith.constant 0 : i32
    return %c0_i32, %arg0 : i32, i32
  }
  func.func @transform_1(%arg0: i32) -> (i32, i32) {
    %c0_i32 = arith.constant 0 : i32
    %c0_i32_0 = arith.constant 0 : i32
    %c0_i32_1 = arith.constant 0 : i32
    return %c0_i32, %c0_i32_0 : i32, i32
  }
  func.func @transform_2(%arg0: i32) -> (i32, i32) {
    %c0_i32 = arith.constant 0 : i32
    %c0_i32_0 = arith.constant 0 : i32
    %c0_i32_1 = arith.constant 0 : i32
    return %c0_i32, %c0_i32_0 : i32, i32
  }
  func.func @transform_3(%arg0: i32) -> (i32, i32) {
    %c0_i32 = arith.constant 0 : i32
    %c0_i32_0 = arith.constant 0 : i32
    %c0_i32_1 = arith.constant 0 : i32
    return %c0_i32, %c0_i32_0 : i32, i32
  }
  func.func @transform_4(%arg0: i32) -> (i32, i32) {
    %c0_i32 = arith.constant 0 : i32
    %c0_i32_0 = arith.constant 0 : i32
    %c0_i32_1 = arith.constant 0 : i32
    return %c0_i32, %c0_i32_0 : i32, i32
  }
  func.func @transform_5(%arg0: i32) -> (i32, i32) {
    %c0_i32 = arith.constant 0 : i32
    %c0_i32_0 = arith.constant 0 : i32
    return %c0_i32, %arg0 : i32, i32
  }
}

</mosaic_0001>

<bundles_post_ra>
// kernel: tpu_custom_call.1
= control target key start
LH: loop header
LB: loop body
LE: loop exit
PB: predicated region body
PF: predicated region fallthrough
CT: control target
= control target key end

     0   :  { %s362_s0 = inlined_call_operand.vmem [shape: bf16[48,128], index: 0, kind: input, shape index: {}]   ;;  %s363_s1 = inlined_call_operand.vmem [shape: bf16[40,48], index: 1, kind: input, shape index: {}]   ;;  %s364_s2 = inlined_call_operand.vmem [shape: f32[32,1], index: 2, kind: input, shape index: {}]   ;;  %s365_s3 = inlined_call_operand.vmem [shape: f32[32,1], index: 3, kind: input, shape index: {}]   ;;  %s366_s4 = inlined_call_operand.<no memory space> [shape: f32[1,1], index: 4, kind: input, shape index: {}]   ;;  %s367_s5 = inlined_call_operand.hbm [shape: f32[1,128], index: 5, kind: output, shape index: {}]  }
   0x1   :  { %v10_v0 = vstv %s366_s4 }
   0x2   :  { %11 = vst [vmem:[#allocation2] sm:$0x1] %v10_v0 }
   0x3   :  { %v238_v1 = vld [vmem:[%s362_s0 + $0x10] sm:$0xff]  ;;  %v99_v2 = vld [vmem:[%s364_s2] sm:$0xff]  ;;  %v282_v3 = vmov 0   ;;  %v237_v5 = vld [vmem:[%s362_s0 + $0x8] sm:$0xff] }
   0x4   :  { %249 = vset.pattern.permute.xlu0 %v282_v3  ;;  %250 = vset.pattern.permute.xlu1 %v282_v3  ;;  %v101_v4 = vld [vmem:[%s364_s2 + $0x10] sm:$0xff]  ;;  %v131_v7 = vld [vmem:[%s365_s3] sm:$0xff] }
   0x5   :  { %81 = vmatpush.bf16.msra.mxu0 %v238_v1  ;;  %241 = vmatpush.bf16.msra.mxu1 %v238_v1  ;;  %v34_v6 = vld [vmem:[%s363_s1 + $0x10] sm:$0xf] }
   0x6   :  { %105 = vperm.xlu0 %249, %v99_v2   ;;  %115 = vperm.xlu1 %250, %v101_v4  }
   0x7   :  { %242 = vmatpush.bf16.msra.mxu2 %v238_v1  ;;  %251 = vset.pattern.permute.xlu2 %v282_v3 }
   0x8   :  { %137 = vperm.xlu2 %251, %v131_v7  }
   0x9   :  { %12 = vsyncpa [#allocation4], 0  ;;  %82 = vmatpush.bf16.msra.mxu0 %v237_v5  ;;  %243 = vmatpush.bf16.msra.mxu1 %v237_v5  ;;  %v236_v8 = vld [vmem:[%s362_s0] sm:$0xff]  ;;  %v44_v9 = vunpack.c.l.b16 %v34_v6  ;;  %v100_v10 = vld [vmem:[%s364_s2 + $0x8] sm:$0xff]  ;;  %vm66_vm0 = vcmask 392192   ;;  %s204_s22 = sshll.u32 %s367_s5, 4  ;;  %s205_s22 = int_to_ptr.hbm [resolvable:$true] %s204_s22 }
   0xa   :  { %v102_v11 = vld [vmem:[%s364_s2 + $0x18] sm:$0xff]  ;;  %v239_v12 = vld [vmem:[%s363_s1] sm:$0xff]  ;;  %v240_v13 = vld [vmem:[%s363_s1 + $0x8] sm:$0xff] }
   0xb   :  { %244 = vmatpush.bf16.msra.mxu2 %v237_v5  ;;  %v47_v14 = vpack.c.b16 %v44_v9, %v44_v9  ;;  %v132_v15 = vld [vmem:[%s365_s3 + $0x8] sm:$0xff]  ;;  %v133_v16 = vld [vmem:[%s365_s3 + $0x10] sm:$0xff]  ;;  %v134_v17 = vld [vmem:[%s365_s3 + $0x18] sm:$0xff]  ;;  %s283_s3 = smov [#allocation3]  }
   0xc   :  { %v169_v18 = vld [vmem:[#allocation2] sm:$0x1]  ;;  %s202_s19 = sshll.u32 %s283_s3, 4  ;;  %s203_s19 = int_to_ptr.vmem [resolvable:$true] %s202_s19 }
   0xd   :  { %83 = vmatpush.bf16.msra.mxu0 %v236_v8  ;;  %245 = vmatpush.bf16.msra.mxu1 %v236_v8 }
   0xe   :  { %110 = vperm.xlu0 %249, %v100_v10   ;;  %120 = vperm.xlu1 %250, %v102_v11  }
   0xf   :  { %246 = vmatpush.bf16.msra.mxu2 %v236_v8 }
  0x10   :  { %233 = vmatmul.msk.bf16.vlgmr.msra.gmra.mxu0 %vm66_vm0, %v239_v12  ;;  %234 = vmatmul.msk.bf16.vlgmr.msra.gmra.mxu1 %vm66_vm0, %v240_v13 }
  0x11   :  { %142 = vperm.xlu2 %251, %v132_v15  }
  0x12   :  { %235 = vmatmul.msk.bf16.vlgmr.msra.gmra.mxu2 %vm66_vm0, %v47_v14 }
  0x16   :  { %147 = vperm.xlu0 %249, %v133_v16   ;;  %152 = vperm.xlu1 %250, %v134_v17  }
  0x19   :  { %172 = vperm.xlu2 %251, %v169_v18  }
  0x62   :  { %v138_v23 = vpop.permute.xlu2 %137 }
  0x6b   :  { %v143_v36 = vpop.permute.xlu2 %142 }
  0x73   :  { %v173_v53 = vpop.permute.xlu2 %172 }
  0x74   :  { %v175_v55 = vperm.slane %v173_v53, 0 }
  0x78   :  { %v106_v19 = vpop.permute.xlu0 %105  ;;  %v116_v20 = vpop.permute.xlu1 %115 }
  0x80   :  { %v111_v24 = vpop.permute.xlu0 %110  ;;  %v121_v26 = vpop.permute.xlu1 %120 }
  0x88   :  { %v148_v40 = vpop.permute.xlu0 %147  ;;  %v153_v43 = vpop.permute.xlu1 %152 }
  0x8d   :  { %v85_v21 = vpop.f32.mrf.mxu0  ;;  %v90_v22 = vpop.f32.mrf.mxu1 }
  0x8e   :  { %v123_v25 = vadd.f32 %v106_v19, %v85_v21  ;;  %v125_v27 = vadd.f32 %v116_v20, %v90_v22 }
  0x90   :  { %v127_v30 = vmax.f32 %v123_v25, 0.0  ;;  %v129_v34 = vmax.f32 %v125_v27, 0.0 }
  0x92   :  { %v155_v37 = vmul.f32 %v138_v23, %v127_v30  ;;  %v157_v41 = vmul.f32 %v148_v40, %v129_v34 }
  0x95   :  { %v87_v28 = vpop.f32.mrf.mxu0  ;;  %v92_v29 = vpop.f32.mrf.mxu1 }
  0x96   :  { %v124_v31 = vadd.f32 %v111_v24, %v87_v28  ;;  %v126_v32 = vadd.f32 %v121_v26, %v92_v29  ;;  %v95_v33 = vpop.f32.mrf.mxu2 }
  0x98   :  { %v128_v35 = vmax.f32 %v124_v31, 0.0  ;;  %v130_v39 = vmax.f32 %v126_v32, 0.0 }
  0x9a   :  { %v156_v38 = vmul.f32 %v143_v36, %v128_v35  ;;  %v158_v44 = vmul.f32 %v153_v43, %v130_v39 }
  0x9c   :  { %v159_v42 = vadd.f32 %v156_v38, %v155_v37 }
  0x9e   :  { %v160_v45 = vadd.f32 %v159_v42, %v157_v41  ;;  %v97_v46 = vpop.f32.mrf.mxu2 }
  0xa0   :  { %v161_v47 = vadd.f32 %v160_v45, %v158_v44 }
  0xa2   :  { %v162_v48 = vrot.slane %v161_v47, 4 }
  0xa4   :  { %v163_v49 = vadd.f32 %v162_v48, %v161_v47 }
  0xa6   :  { %v164_v50 = vrot.slane %v163_v49, 2 }
  0xa8   :  { %v165_v51 = vadd.f32 %v164_v50, %v163_v49 }
  0xaa   :  { %v166_v52 = vrot.slane %v165_v51, 1 }
  0xac   :  { %v167_v54 = vadd.f32 %v166_v52, %v165_v51 }
  0xae   :  { %v168_v56 = vadd.f32 %v167_v54, %v95_v33 }
  0xb0   :  { %v176_v57 = vadd.f32 %v175_v55, %v168_v56 }
  0xb2   :  { %v177_v58 = vsub.f32 0.0, %v176_v57 }
  0xb4   :  { %v178_v59 = vmul.f32 1.442695, %v177_v58 }
  0xb6   :  { %252 = vpow2.f32 %v178_v59 }
  0xbc   :  { %v253_v60 = vpop.eup %252 }
  0xbd   :  { %v180_v61 = vadd.f32 1.0, %v253_v60 }
  0xbf   :  { %254 = vrcp.f32 %v180_v61  ;;  %v192_v1 = vand.u32 2147483648, %v180_v61  ;;  %v190_v3 = vand.u32 2147483647, %v180_v61  ;;  %vm186_vm2 = vweird.f32 %v180_v61 }
  0xc1   :  { %v193_v5 = vor.u32 1.1754944e-38, %v192_v1  ;;  %vm191_vm4 = vcmp.eq.f32.partialorder %v190_v3, 8.507059e+37 }
  0xc5   :  { %v255_v62 = vpop.eup %254 }
  0xc6   :  { %v182_v63 = vmul.f32 %v255_v62, %v180_v61  ;;  %vm187_vm1 = vweird.f32 %v255_v62 }
  0xc7   :  { %vm188_vm3 = vmor %vm186_vm2, %vm187_vm1 }
  0xc8   :  { %v183_v0 = vsub.f32 1.0, %v182_v63 }
  0xca   :  { %v184_v2 = vmul.f32 %v255_v62, %v183_v0 }
  0xcc   :  { %v185_v4 = vadd.f32 %v255_v62, %v184_v2 }
  0xce   :  { %v189_v6 = vsel %vm188_vm3, %v255_v62, %v185_v4 }
  0xcf   :  { %v194_v7 = vsel %vm191_vm4, %v193_v5, %v189_v6 }
  0xd0   :  { %v195_v8 = vmul.f32 10.0, %v194_v7 }
  0xd2   :  { %196 = vst [vmem:[#allocation3] sm:$0x1] %v195_v8 }
  0xd3   :  { %207 = dma.vmem_to_hbm [thread:$0]  %s203_s19, 16, %s205_s22, [#allocation4]  }
  0xd4   :  { %280 = dma.done.wait [#allocation4], 16  }
  0xd5   :  { %281 = vsyncadd [#allocation4], 4294967280 }
  0xd6   :  { %212 = vsyncpa [#allocation4], 1 }

</bundles_post_ra>
